<compile_context>
chip_gen: v5e
topology: v5e:2x2
jax: 0.10.0
libtpu: 0.0.40
codegen_flags: <defaults>
</compile_context>

<pallas_src>
import jax
import jax.numpy as jnp
from jax.experimental import pallas as pl
from jax.experimental.pallas import tpu as pltpu


LANE = 128          # vreg lane width
MAX_BATCH_TILE = 512


def _round_up(n, m):
    return ((n + m - 1) // m) * m


# ----------------------------- fused Pallas kernel ---------------------------

def _build_fused_kernel(layer_kinds, capture_layers, pad):
    """Kernel refs: (x, W_packed, b_packed, out_packed).

    x:        (tb, pad)                 padded input rows
    W_packed: (num_linear, pad, pad)    zero-padded weights, [in, out] layout
    b_packed: (num_linear, 1, pad)      zero-padded biases
    out:      (tb, num_captures * pad)  packed captured activations
    """
    capture_set = frozenset(capture_layers)

    def kernel(x_ref, w_ref, b_ref, out_ref):
        h = x_ref[...]
        pi = 0  # linear-parameter cursor (static)
        oi = 0  # capture cursor (static, ascending layer order)
        for ln, kind in enumerate(layer_kinds):
            if kind == "linear":
                # MXU matmul + VPU bias add, all on VMEM-resident data.
                h = jnp.dot(h, w_ref[pi], preferred_element_type=jnp.float32)
                h = h + b_ref[pi]
                pi += 1
            elif kind == "relu":
                h = jnp.maximum(h, 0.0)
            else:
                raise ValueError(f"unknown layer kind {kind}")
            if ln in capture_set:
                # 128-aligned, lane-dense (unmasked) store into the output slab.
                out_ref[:, oi * pad:(oi + 1) * pad] = h.astype(out_ref.dtype)
                oi += 1

    return kernel


# ----------------------- NetWithActivations (JAX/Pallas) ---------------------

class NetWithActivationsPallas:
    """Mirrors PyTorch NetWithActivations.forward semantics; runs the whole
    layer chain as one fused, batch-tiled Pallas kernel."""

    def __init__(self, layers, layer_nums):
        self.layers = list(layers)
        n_layers = len(self.layers)
        nums = set((n_layers + l) if l < 0 else l for l in layer_nums)
        self.layer_nums = nums

        # ---- scan layers: kinds, real widths, linear params -------------
        layer_kinds = []
        real_width_after = []          # real feature width after each layer
        linears = []                   # (K, N, w, b) in order
        cur = None
        in_width = None
        for layer in self.layers:
            kind = layer[0]
            layer_kinds.append(kind)
            if kind == "linear":
                _, w, b = layer
                K, N = w.shape
                if cur is None:
                    in_width, cur = K, K
                assert K == cur, "layer input width mismatch"
                linears.append((K, N, w, b))
                cur = N
            elif kind == "relu":
                assert cur is not None, "first layer must be linear here"
            else:
                raise ValueError(f"unknown layer kind {kind}")
            real_width_after.append(cur)

        num_linear = len(linears)
        # Common padded feature width (all layer widths <= 128 here).
        pad = _round_up(max([in_width] + [n for (_, n, _, _) in linears]), LANE)
        self._pad = pad
        self._in_width = in_width

        # ---- pack parameters once: 3 arrays total -> 3 input DMAs -------
        w_packed = jnp.zeros((num_linear, pad, pad), dtype=jnp.float32)
        b_packed = jnp.zeros((num_linear, 1, pad), dtype=jnp.float32)
        for i, (K, N, w, b) in enumerate(linears):
            w_packed = w_packed.at[i, :K, :N].set(w.astype(jnp.float32))
            b_packed = b_packed.at[i, 0, :N].set(b.astype(jnp.float32))
        self._w_packed = w_packed
        self._b_packed = b_packed

        # ---- capture bookkeeping (ascending layer order) ----------------
        out_info = []  # (layer_num, slab_slot, real_width)
        for oi, ln in enumerate(sorted(nums)):
            out_info.append((ln, oi, real_width_after[ln]))
        self._out_info = tuple(out_info)
        num_caps = len(out_info)

        kernel = _build_fused_kernel(tuple(layer_kinds), sorted(nums), pad)

        def forward(x, wp, bp):
            B, K = x.shape
            # Batch tile: amortize the ~0.35us per-step overhead over many rows,
            # but cap the tile so the double-buffered working set stays tiny
            # (v5e default scoped VMEM is only 16 MiB).
            tb = min(_round_up(B, 8), MAX_BATCH_TILE)
            Bp = _round_up(B, tb)
            # Lane/sublane-dense padded input (zeros are exact through the net).
            x_pad = jnp.zeros((Bp, pad), jnp.float32).at[:B, :K].set(x)

            out = pl.pallas_call(
                kernel,
                out_shape=jax.ShapeDtypeStruct((Bp, num_caps * pad), jnp.float32),
                grid_spec=pltpu.PrefetchScalarGridSpec(
                    num_scalar_prefetch=0,
                    grid=(Bp // tb,),
                    in_specs=[
                        pl.BlockSpec((tb, pad), lambda i: (i, 0)),
                        # Weights/biases: same block every step -> VMEM resident.
                        pl.BlockSpec((num_linear, pad, pad), lambda i: (0, 0, 0)),
                        pl.BlockSpec((num_linear, 1, pad), lambda i: (0, 0, 0)),
                    ],
                    out_specs=pl.BlockSpec((tb, num_caps * pad), lambda i: (i, 0)),
                ),
                compiler_params=pltpu.CompilerParams(
                    dimension_semantics=("parallel",)),
            )(x_pad, wp, bp)

            # Split the packed slab into the requested activations (inside jit;
            # layout plumbing only).
            acts = {}
            for (ln, oi, rw) in out_info:
                acts[ln] = out[:B, oi * pad: oi * pad + rw]
            return acts

        self._forward = jax.jit(forward)

    def __call__(self, x):
        return self._forward(x, self._w_packed, self._b_packed)


# --------------------------------- reference ---------------------------------

def _reference_forward(layers, layer_nums, x):
    acts = {}
    nums = set((len(layers) + l) if l < 0 else l for l in layer_nums)
    for ln, layer in enumerate(layers):
        if layer[0] == "linear":
            _, w, b = layer
            x = x @ w + b
        else:
            x = jnp.maximum(x, 0.0)
        if ln in nums:
            acts[ln] = x
    return acts


# ----------------------------------- main -------------------------------------

if __name__ == "__main__":
    key = jax.random.PRNGKey(0)
    batch, d_in, d_hidden, d_out = 8, 32, 64, 16

    k_x, k_w0, k_b0, k_w1, k_b1, k_w2, k_b2 = jax.random.split(key, 7)

    x = jax.random.normal(k_x, (batch, d_in), dtype=jnp.float32)

    # Deterministic parameter init (weights stored [in, out]).
    w0 = jax.random.normal(k_w0, (d_in, d_hidden), dtype=jnp.float32) * 0.1
    b0 = jax.random.normal(k_b0, (d_hidden,), dtype=jnp.float32) * 0.1
    w1 = jax.random.normal(k_w1, (d_hidden, d_hidden), dtype=jnp.float32) * 0.1
    b1 = jax.random.normal(k_b1, (d_hidden,), dtype=jnp.float32) * 0.1
    w2 = jax.random.normal(k_w2, (d_hidden, d_out), dtype=jnp.float32) * 0.1
    b2 = jax.random.normal(k_b2, (d_out,), dtype=jnp.float32) * 0.1

    layers = [
        ("linear", w0, b0),   # layer 0
        ("relu",),            # layer 1
        ("linear", w1, b1),   # layer 2
        ("relu",),            # layer 3
        ("linear", w2, b2),   # layer 4
    ]
    layer_nums = [1, 3, -1]   # -> activations at {1, 3, 4}

    net = NetWithActivationsPallas(layers, layer_nums)
    activations = net(x)
    jax.block_until_ready(activations)

    # Verify against a plain-JAX reference (unpadded math).
    ref = _reference_forward(layers, layer_nums, x)
    assert set(activations.keys()) == set(ref.keys()), (activations.keys(), ref.keys())
    for k in ref:
        assert activations[k].shape == ref[k].shape, (
            k, activations[k].shape, ref[k].shape)
        err = float(jnp.max(jnp.abs(activations[k] - ref[k])))
        assert err < 1e-4, f"layer {k} mismatch: {err}"

    print("KERNEL_OK")
</pallas_src>

<mosaic_0001>
module attributes {stable_mosaic.version = 11 : i64} {
  func.func @kernel(%arg0: i32, %arg1: memref<8x128xf32, #tpu.memory_space<vmem>>, %arg2: memref<3x128x128xf32, #tpu.memory_space<vmem>>, %arg3: memref<3x1x128xf32, #tpu.memory_space<vmem>>, %arg4: memref<8x384xf32, #tpu.memory_space<vmem>>) attributes {dimension_semantics = [#tpu.dimension_semantics<parallel>], iteration_bounds = array<i64: 1>, scalar_prefetch = 0 : i64, scratch_operands = 0 : i64, tpu.core_type = #tpu.core_type<tc>, window_params = [{transform_indices = @transform_0, window_bounds = array<i64: 8, 128>}, {pipeline_mode = #tpu.pipeline_mode<synchronous>, transform_indices = @transform_1, window_bounds = array<i64: 3, 128, 128>}, {pipeline_mode = #tpu.pipeline_mode<synchronous>, transform_indices = @transform_2, window_bounds = array<i64: 3, 1, 128>}, {transform_indices = @transform_3, window_bounds = array<i64: 8, 384>}]} {
    %c0 = arith.constant 0 : index
    %c0_0 = arith.constant 0 : index
    %0 = vector.load %arg1[%c0, %c0_0] : memref<8x128xf32, #tpu.memory_space<vmem>>, vector<8x128xf32>
    %c0_1 = arith.constant 0 : index
    %c0_2 = arith.constant 0 : index
    %c0_3 = arith.constant 0 : index
    %1 = vector.load %arg2[%c0_1, %c0_2, %c0_3] : memref<3x128x128xf32, #tpu.memory_space<vmem>>, vector<1x128x128xf32>
    %2 = vector.shape_cast %1 : vector<1x128x128xf32> to vector<128x128xf32>
    %cst = arith.constant dense<0.000000e+00> : vector<8x128xf32>
    %3 = tpu.matmul %0, %2, %cst {dimension_numbers = #tpu.dot_dimension_numbers<[1], [0], [0], [1], [0, 0, 1, 1], [], []>} : vector<8x128xf32>, vector<128x128xf32>, vector<8x128xf32> -> vector<8x128xf32>
    %c0_4 = arith.constant 0 : index
    %c0_5 = arith.constant 0 : index
    %c0_6 = arith.constant 0 : index
    %4 = vector.load %arg3[%c0_4, %c0_5, %c0_6] : memref<3x1x128xf32, #tpu.memory_space<vmem>>, vector<1x1x128xf32>
    %5 = vector.shape_cast %4 : vector<1x1x128xf32> to vector<1x128xf32>
    %6 = vector.broadcast %5 : vector<1x128xf32> to vector<8x128xf32>
    %7 = arith.addf %3, %6 : vector<8x128xf32>
    %cst_7 = arith.constant 0.000000e+00 : f32
    %8 = vector.broadcast %cst_7 : f32 to vector<8x128xf32>
    %9 = arith.maximumf %7, %8 : vector<8x128xf32>
    %c0_8 = arith.constant 0 : index
    %c0_9 = arith.constant 0 : index
    %10 = vector.load %arg4[%c0_8, %c0_9] : memref<8x384xf32, #tpu.memory_space<vmem>>, vector<8x128xf32>
    tpu.vector_store %arg4[%c0_8, %c0_9], %9 {strides = array<i32>} : memref<8x384xf32, #tpu.memory_space<vmem>>, vector<8x128xf32>,
    %c1 = arith.constant 1 : index
    %c0_10 = arith.constant 0 : index
    %c0_11 = arith.constant 0 : index
    %11 = vector.load %arg2[%c1, %c0_10, %c0_11] : memref<3x128x128xf32, #tpu.memory_space<vmem>>, vector<1x128x128xf32>
    %12 = vector.shape_cast %11 : vector<1x128x128xf32> to vector<128x128xf32>
    %cst_12 = arith.constant dense<0.000000e+00> : vector<8x128xf32>
    %13 = tpu.matmul %9, %12, %cst_12 {dimension_numbers = #tpu.dot_dimension_numbers<[1], [0], [0], [1], [0, 0, 1, 1], [], []>} : vector<8x128xf32>, vector<128x128xf32>, vector<8x128xf32> -> vector<8x128xf32>
    %c1_13 = arith.constant 1 : index
    %c0_14 = arith.constant 0 : index
    %c0_15 = arith.constant 0 : index
    %14 = vector.load %arg3[%c1_13, %c0_14, %c0_15] : memref<3x1x128xf32, #tpu.memory_space<vmem>>, vector<1x1x128xf32>
    %15 = vector.shape_cast %14 : vector<1x1x128xf32> to vector<1x128xf32>
    %16 = vector.broadcast %15 : vector<1x128xf32> to vector<8x128xf32>
    %17 = arith.addf %13, %16 : vector<8x128xf32>
    %cst_16 = arith.constant 0.000000e+00 : f32
    %18 = vector.broadcast %cst_16 : f32 to vector<8x128xf32>
    %19 = arith.maximumf %17, %18 : vector<8x128xf32>
    %c0_17 = arith.constant 0 : index
    %c128 = arith.constant 128 : index
    %20 = vector.load %arg4[%c0_17, %c128] : memref<8x384xf32, #tpu.memory_space<vmem>>, vector<8x128xf32>
    tpu.vector_store %arg4[%c0_17, %c128], %19 {strides = array<i32>} : memref<8x384xf32, #tpu.memory_space<vmem>>, vector<8x128xf32>,
    %c2 = arith.constant 2 : index
    %c0_18 = arith.constant 0 : index
    %c0_19 = arith.constant 0 : index
    %21 = vector.load %arg2[%c2, %c0_18, %c0_19] : memref<3x128x128xf32, #tpu.memory_space<vmem>>, vector<1x128x128xf32>
    %22 = vector.shape_cast %21 : vector<1x128x128xf32> to vector<128x128xf32>
    %cst_20 = arith.constant dense<0.000000e+00> : vector<8x128xf32>
    %23 = tpu.matmul %19, %22, %cst_20 {dimension_numbers = #tpu.dot_dimension_numbers<[1], [0], [0], [1], [0, 0, 1, 1], [], []>} : vector<8x128xf32>, vector<128x128xf32>, vector<8x128xf32> -> vector<8x128xf32>
    %c2_21 = arith.constant 2 : index
    %c0_22 = arith.constant 0 : index
    %c0_23 = arith.constant 0 : index
    %24 = vector.load %arg3[%c2_21, %c0_22, %c0_23] : memref<3x1x128xf32, #tpu.memory_space<vmem>>, vector<1x1x128xf32>
    %25 = vector.shape_cast %24 : vector<1x1x128xf32> to vector<1x128xf32>
    %26 = vector.broadcast %25 : vector<1x128xf32> to vector<8x128xf32>
    %27 = arith.addf %23, %26 : vector<8x128xf32>
    %c0_24 = arith.constant 0 : index
    %c256 = arith.constant 256 : index
    %28 = vector.load %arg4[%c0_24, %c256] : memref<8x384xf32, #tpu.memory_space<vmem>>, vector<8x128xf32>
    tpu.vector_store %arg4[%c0_24, %c256], %27 {strides = array<i32>} : memref<8x384xf32, #tpu.memory_space<vmem>>, vector<8x128xf32>,
    return
  }
  func.func @transform_0(%arg0: i32) -> (i32, i32) {
    %c0_i32 = arith.constant 0 : i32
    %c0_i32_0 = arith.constant 0 : i32
    return %arg0, %c0_i32 : i32, i32
  }
  func.func @transform_1(%arg0: i32) -> (i32, i32, i32) {
    %c0_i32 = arith.constant 0 : i32
    %c0_i32_0 = arith.constant 0 : i32
    %c0_i32_1 = arith.constant 0 : i32
    %c0_i32_2 = arith.constant 0 : i32
    return %c0_i32, %c0_i32_0, %c0_i32_1 : i32, i32, i32
  }
  func.func @transform_2(%arg0: i32) -> (i32, i32, i32) {
    %c0_i32 = arith.constant 0 : i32
    %c0_i32_0 = arith.constant 0 : i32
    %c0_i32_1 = arith.constant 0 : i32
    %c0_i32_2 = arith.constant 0 : i32
    return %c0_i32, %c0_i32_0, %c0_i32_1 : i32, i32, i32
  }
  func.func @transform_3(%arg0: i32) -> (i32, i32) {
    %c0_i32 = arith.constant 0 : i32
    %c0_i32_0 = arith.constant 0 : i32
    return %arg0, %c0_i32 : i32, i32
  }
}

</mosaic_0001>

<bundles_post_ra>
// kernel: forward.1
= control target key start
LH: loop header
LB: loop body
LE: loop exit
PB: predicated region body
PF: predicated region fallthrough
CT: control target
= control target key end

     0   :  { %8 = vsyncpa [#allocation3], 0  ;;  %s199_s15 = smov [#allocation2]   ;;  %s200_s17 = smov 128   ;;  %s246_s0 = inlined_call_operand.vmem [shape: f32[8,128], index: 0, kind: input, shape index: {}]   ;;  %s247_s1 = inlined_call_operand.hbm [shape: f32[3,128,128], index: 1, kind: input, shape index: {}]   ;;  %s248_s2 = inlined_call_operand.vmem [shape: f32[3,1,128], index: 2, kind: input, shape index: {}]   ;;  %s249_s3 = inlined_call_operand.vmem [shape: f32[8,384], index: 3, kind: output, shape index: {}]  }
   0x1   :  { %s15_s14 = sshll.u32 %s247_s1, 4  ;;  %s17_s16 = sshll.u32 %s199_s15, 4  ;;  %s16_s14 = int_to_ptr.hbm [resolvable:$true] %s15_s14  ;;  %s18_s16 = int_to_ptr.vmem [resolvable:$true] %s17_s16 }
   0x2   :  { %s201_s18 = smov 8  }
   0x3   :  { %23 = dma.hbm_to_vmem [thread:$0]  %s16_s14, 6144, %s18_s16, [#allocation3], %s200_s17, %s200_s17, %s201_s18  }
   0x4   :  { %197 = dma.done.wait [#allocation3], 6144  }
   0x5   :  { %198 = vsyncadd [#allocation3], 4294961152  ;;  %v46_v0 = vld [vmem:[#allocation2 + $0x78] sm:$0xff]  ;;  %v45_v1 = vld [vmem:[#allocation2 + $0x70] sm:$0xff] }
   0x6   :  { %51 = vmatpush.msra.mxu0 %v46_v0  ;;  %v44_v2 = vld [vmem:[#allocation2 + $0x68] sm:$0xff]  ;;  %v43_v3 = vld [vmem:[#allocation2 + $0x60] sm:$0xff]  ;;  %v89_v4 = vld [vmem:[#allocation2 + $0xf8] sm:$0xff] }
   0x7   :  { %v42_v5 = vld [vmem:[#allocation2 + $0x58] sm:$0xff]  ;;  %95 = vmatpush.msra.mxu1 %v89_v4  ;;  %v88_v6 = vld [vmem:[#allocation2 + $0xf0] sm:$0xff]  ;;  %v87_v7 = vld [vmem:[#allocation2 + $0xe8] sm:$0xff] }
   0x8   :  { %52 = vmatpush.msra.mxu0 %v45_v1  ;;  %v41_v8 = vld [vmem:[#allocation2 + $0x50] sm:$0xff]  ;;  %v86_v9 = vld [vmem:[#allocation2 + $0xe0] sm:$0xff]  ;;  %v40_v10 = vld [vmem:[#allocation2 + $0x48] sm:$0xff] }
   0x9   :  { %96 = vmatpush.msra.mxu1 %v88_v6  ;;  %v85_v11 = vld [vmem:[#allocation2 + $0xd8] sm:$0xff]  ;;  %v39_v12 = vld [vmem:[#allocation2 + $0x40] sm:$0xff]  ;;  %v84_v13 = vld [vmem:[#allocation2 + $0xd0] sm:$0xff] }
   0xa   :  { %53 = vmatpush.msra.mxu0 %v44_v2  ;;  %v38_v14 = vld [vmem:[#allocation2 + $0x38] sm:$0xff]  ;;  %v83_v15 = vld [vmem:[#allocation2 + $0xc8] sm:$0xff]  ;;  %v37_v16 = vld [vmem:[#allocation2 + $0x30] sm:$0xff] }
   0xb   :  { %97 = vmatpush.msra.mxu1 %v87_v7  ;;  %v82_v17 = vld [vmem:[#allocation2 + $0xc0] sm:$0xff]  ;;  %v36_v18 = vld [vmem:[#allocation2 + $0x28] sm:$0xff]  ;;  %v81_v19 = vld [vmem:[#allocation2 + $0xb8] sm:$0xff] }
   0xc   :  { %54 = vmatpush.msra.mxu0 %v43_v3  ;;  %v35_v20 = vld [vmem:[#allocation2 + $0x20] sm:$0xff]  ;;  %v80_v21 = vld [vmem:[#allocation2 + $0xb0] sm:$0xff]  ;;  %v34_v22 = vld [vmem:[#allocation2 + $0x18] sm:$0xff] }
   0xd   :  { %98 = vmatpush.msra.mxu1 %v86_v9  ;;  %v79_v23 = vld [vmem:[#allocation2 + $0xa8] sm:$0xff]  ;;  %v33_v24 = vld [vmem:[#allocation2 + $0x10] sm:$0xff]  ;;  %v78_v25 = vld [vmem:[#allocation2 + $0xa0] sm:$0xff] }
   0xe   :  { %55 = vmatpush.msra.mxu0 %v42_v5  ;;  %v32_v26 = vld [vmem:[#allocation2 + $0x8] sm:$0xff]  ;;  %v77_v27 = vld [vmem:[#allocation2 + $0x98] sm:$0xff]  ;;  %v31_v28 = vld [vmem:[#allocation2] sm:$0xff] }
   0xf   :  { %99 = vmatpush.msra.mxu1 %v85_v11  ;;  %v30_v29 = vld [vmem:[%s246_s0] sm:$0xff]  ;;  %v76_v30 = vld [vmem:[#allocation2 + $0x90] sm:$0xff]  ;;  %v75_v31 = vld [vmem:[#allocation2 + $0x88] sm:$0xff] }
  0x10   :  { %56 = vmatpush.msra.mxu0 %v41_v8  ;;  %v74_v32 = vld [vmem:[#allocation2 + $0x80] sm:$0xff]  ;;  %v133_v33 = vld [vmem:[#allocation2 + $0x178] sm:$0xff]  ;;  %v132_v34 = vld [vmem:[#allocation2 + $0x170] sm:$0xff] }
  0x11   :  { %100 = vmatpush.msra.mxu1 %v84_v13  ;;  %139 = vmatpush.msra.mxu2 %v133_v33  ;;  %v131_v35 = vld [vmem:[#allocation2 + $0x168] sm:$0xff]  ;;  %v130_v36 = vld [vmem:[#allocation2 + $0x160] sm:$0xff]  ;;  %v129_v37 = vld [vmem:[#allocation2 + $0x158] sm:$0xff] }
  0x12   :  { %57 = vmatpush.msra.mxu0 %v40_v10  ;;  %v128_v38 = vld [vmem:[#allocation2 + $0x150] sm:$0xff]  ;;  %v127_v39 = vld [vmem:[#allocation2 + $0x148] sm:$0xff]  ;;  %v126_v40 = vld [vmem:[#allocation2 + $0x140] sm:$0xff] }
  0x13   :  { %101 = vmatpush.msra.mxu1 %v83_v15  ;;  %140 = vmatpush.msra.mxu2 %v132_v34  ;;  %v125_v41 = vld [vmem:[#allocation2 + $0x138] sm:$0xff]  ;;  %v124_v42 = vld [vmem:[#allocation2 + $0x130] sm:$0xff]  ;;  %v123_v43 = vld [vmem:[#allocation2 + $0x128] sm:$0xff] }
  0x14   :  { %58 = vmatpush.msra.mxu0 %v39_v12  ;;  %v122_v44 = vld [vmem:[#allocation2 + $0x120] sm:$0xff]  ;;  %v121_v45 = vld [vmem:[#allocation2 + $0x118] sm:$0xff]  ;;  %v120_v50 = vld [vmem:[#allocation2 + $0x110] sm:$0xff] }
  0x15   :  { %102 = vmatpush.msra.mxu1 %v82_v17  ;;  %141 = vmatpush.msra.mxu2 %v131_v35  ;;  %v170_v46 = vld [vmem:[%s248_s2] ss:$0 sm:$0xff]  ;;  %v119_v51 = vld [vmem:[#allocation2 + $0x108] sm:$0xff]  ;;  %v171_v53 = vld [vmem:[%s248_s2 + $0x1] ss:$0 sm:$0xff] }
  0x16   :  { %59 = vmatpush.msra.mxu0 %v38_v14  ;;  %v118_v52 = vld [vmem:[#allocation2 + $0x100] sm:$0xff] }
  0x17   :  { %103 = vmatpush.msra.mxu1 %v81_v19  ;;  %142 = vmatpush.msra.mxu2 %v130_v36  ;;  %v172_v57 = vld [vmem:[%s248_s2 + $0x2] ss:$0 sm:$0xff] }
  0x18   :  { %60 = vmatpush.msra.mxu0 %v37_v16 }
  0x19   :  { %104 = vmatpush.msra.mxu1 %v80_v21  ;;  %143 = vmatpush.msra.mxu2 %v129_v37 }
  0x1a   :  { %61 = vmatpush.msra.mxu0 %v36_v18 }
  0x1b   :  { %105 = vmatpush.msra.mxu1 %v79_v23  ;;  %144 = vmatpush.msra.mxu2 %v128_v38 }
  0x1c   :  { %62 = vmatpush.msra.mxu0 %v35_v20 }
  0x1d   :  { %106 = vmatpush.msra.mxu1 %v78_v25  ;;  %145 = vmatpush.msra.mxu2 %v127_v39 }
  0x1e   :  { %63 = vmatpush.msra.mxu0 %v34_v22 }
  0x1f   :  { %107 = vmatpush.msra.mxu1 %v77_v27  ;;  %146 = vmatpush.msra.mxu2 %v126_v40 }
  0x20   :  { %64 = vmatpush.msra.mxu0 %v33_v24 }
  0x21   :  { %108 = vmatpush.msra.mxu1 %v76_v30  ;;  %147 = vmatpush.msra.mxu2 %v125_v41 }
  0x22   :  { %65 = vmatpush.msra.mxu0 %v32_v26 }
  0x23   :  { %109 = vmatpush.msra.mxu1 %v75_v31  ;;  %148 = vmatpush.msra.mxu2 %v124_v42 }
  0x24   :  { %66 = vmatpush.msra.mxu0 %v31_v28 }
  0x25   :  { %67 = vmatmul.f32.vlgmr.msra.gmra.mxu0 %v30_v29  ;;  %110 = vmatpush.msra.mxu1 %v74_v32 }
  0x26   :  { %149 = vmatpush.msra.mxu2 %v123_v43 }
  0x28   :  { %150 = vmatpush.msra.mxu2 %v122_v44 }
  0x2a   :  { %151 = vmatpush.msra.mxu2 %v121_v45 }
  0x2c   :  { %152 = vmatpush.msra.mxu2 %v120_v50 }
  0x2e   :  { %153 = vmatpush.msra.mxu2 %v119_v51 }
  0x30   :  { %154 = vmatpush.msra.mxu2 %v118_v52 }
  0xa2   :  { %v68_v47 = vpop.f32.mrf.mxu0 }
  0xa3   :  { %v69_v48 = vadd.f32 %v170_v46, %v68_v47 }
  0xa5   :  { %v71_v49 = vmax.f32 %v69_v48, 0.0 }
  0xa7   :  { %72 = vst [vmem:[%s249_s3] sm:$0xff] %v71_v49  ;;  %111 = vmatmul.f32.vlgmr.msra.gmra.mxu1 %v71_v49 }
 0x124   :  { %v112_v54 = vpop.f32.mrf.mxu1 }
 0x125   :  { %v113_v55 = vadd.f32 %v171_v53, %v112_v54 }
 0x127   :  { %v115_v56 = vmax.f32 %v113_v55, 0.0 }
 0x129   :  { %116 = vst [vmem:[%s249_s3 + $0x8] sm:$0xff] %v115_v56  ;;  %155 = vmatmul.f32.vlgmr.msra.gmra.mxu2 %v115_v56 }
 0x1ac   :  { %v156_v58 = vpop.f32.mrf.mxu2 }
 0x1ad   :  { %v157_v59 = vadd.f32 %v172_v57, %v156_v58 }
 0x1af   :  { %159 = vst [vmem:[%s249_s3 + $0x10] sm:$0xff] %v157_v59 }
 0x1b0   :  { %164 = vsyncpa [#allocation3], 1 }

</bundles_post_ra>
